<compile_context>
chip_gen: v5e
topology: v5e:2x2
jax: 0.10.0
libtpu: 0.0.40
codegen_flags: <defaults>
</compile_context>

<pallas_src>
import math
import functools

import jax
import jax.numpy as jnp
import numpy as np
from jax.experimental import pallas as pl
from jax.experimental.pallas import tpu as pltpu


def _round_up(n, m):
    return ((n + m - 1) // m) * m


def _rhn_context_kernel(x_ref, s_ref, ctx_ref,
                        win_h_ref, win_t_ref, bin_h_ref, bin_t_ref,
                        wc_h_ref, wc_t_ref, bc_h_ref, bc_t_ref,
                        s_all_ref, *, depth):
    """Processes one (TB, H_pad) batch tile for all `depth` micro-steps.

    Matmuls run on the MXU with bf16 operands and f32 accumulation; the gate
    nonlinearities / highway update stay in f32 (v5e's VPU & EUP have no bf16).
    H and T gate weights are pre-split so each matmul output is lane-dense.
    """
    x_bf = x_ref[...].astype(jnp.bfloat16)        # (TB, E_pad)
    s = s_ref[...]                                # (TB, H_pad) f32
    ctx = ctx_ref[...]                            # (TB, E_pad) f32

    # Input projection contributes only at depth 0 -> hoist out of the loop.
    inp_h = jnp.dot(x_bf, win_h_ref[...], preferred_element_type=jnp.float32) + bin_h_ref[...]
    inp_t = jnp.dot(x_bf, win_t_ref[...], preferred_element_type=jnp.float32) + bin_t_ref[...]

    # depth is a small static constant -> Python unroll.  For depth >~8, switch to
    # lax.fori_loop with dynamic wc_*_ref[l] indexing to bound vreg live ranges.
    for l in range(depth):
        sc = (s * ctx).astype(jnp.bfloat16)       # (TB, H_pad) bf16 MXU operand
        pre_h = jnp.dot(sc, wc_h_ref[l], preferred_element_type=jnp.float32) + bc_h_ref[l]
        pre_t = jnp.dot(sc, wc_t_ref[l], preferred_element_type=jnp.float32) + bc_t_ref[l]
        if l == 0:
            pre_h = pre_h + inp_h
            pre_t = pre_t + inp_t
        hh = jnp.tanh(pre_h)
        tt = jax.nn.sigmoid(pre_t)
        # highwayGate: hh * tt + s * (1 - tt)   (dropout is identity when not training)
        s = hh * tt + s * (1.0 - tt)
        s_all_ref[l] = s.astype(s_all_ref.dtype)


def rhn_context_cell(x, s, ctx, w_in, b_in, w_cell, b_cell, *,
                     trainable=False, gate_drop=0.0, batch_tile=None):
    """Pallas implementation of RHNContextCell.forward (s passed as a tensor).

    x:      (B, embedDim)
    s:      (B, h)                 with h == embedDim
    ctx:    (B, >= embedDim)       only ctx[:, :embedDim] is used (j stays 0)
    w_in:   (embedDim, 2h)   b_in:   (1, 2h)        (nn.Linear weights pre-transposed)
    w_cell: (depth, h, 2h)   b_cell: (depth, 2h)
    Returns (s_final, s_final, [s after each depth step]) like the PyTorch module.
    """
    if trainable and gate_drop > 0.0:
        # TODO(synk): training-mode gate dropout (F.dropout on tt) not implemented in-kernel.
        raise NotImplementedError("gate dropout (trainable=True) not implemented")

    B, embed_dim = x.shape
    h = s.shape[1]
    depth = w_cell.shape[0]
    assert h == embed_dim, "original module requires h == embedDim for s * ctx[:, :embedDim]"

    # ---- lane/sublane-aligned padded sizes ----------------------------------
    H_pad = _round_up(h, 128)          # lane-dense features
    E_pad = H_pad                      # embed_dim == h
    if batch_tile is None:
        batch_tile = min(256, _round_up(B, 8))   # fill the MXU for large batches
    TB = _round_up(batch_tile, 8)
    B_pad = _round_up(B, TB)
    n_tiles = B_pad // TB

    f32, bf16 = jnp.float32, jnp.bfloat16

    def pad2(a, r, c):
        a = a.astype(f32)
        return jnp.pad(a, ((0, r - a.shape[0]), (0, c - a.shape[1])))

    # ---- split H / T gate halves, zero-pad, cast weights to bf16 ------------
    w_in_h = pad2(w_in[:, :h], E_pad, H_pad).astype(bf16)
    w_in_t = pad2(w_in[:, h:], E_pad, H_pad).astype(bf16)
    b_in_h = pad2(b_in[:, :h], 1, H_pad)
    b_in_t = pad2(b_in[:, h:], 1, H_pad)

    wc_h = jnp.pad(w_cell[:, :, :h].astype(f32),
                   ((0, 0), (0, H_pad - h), (0, H_pad - h))).astype(bf16)
    wc_t = jnp.pad(w_cell[:, :, h:].astype(f32),
                   ((0, 0), (0, H_pad - h), (0, H_pad - h))).astype(bf16)
    bc_h = jnp.pad(b_cell[:, :h].astype(f32)[:, None, :],
                   ((0, 0), (0, 0), (0, H_pad - h)))
    bc_t = jnp.pad(b_cell[:, h:].astype(f32)[:, None, :],
                   ((0, 0), (0, 0), (0, H_pad - h)))

    # Padded feature columns stay exactly zero through the recurrence
    # (pre=0 -> tanh(0)*sigmoid(0) + 0*(1-sigmoid(0)) = 0), so real columns are exact.
    x_p = pad2(x, B_pad, E_pad)
    s_p = pad2(s, B_pad, H_pad)
    ctx_p = pad2(ctx[:, :embed_dim], B_pad, E_pad)

    kernel = functools.partial(_rhn_context_kernel, depth=depth)

    tile_spec_e = pl.BlockSpec((TB, E_pad), lambda i: (i, 0))
    tile_spec_h = pl.BlockSpec((TB, H_pad), lambda i: (i, 0))
    # Weights / biases: constant index_map -> resident in VMEM across batch tiles.
    w2_spec = pl.BlockSpec((E_pad, H_pad), lambda i: (0, 0))
    b2_spec = pl.BlockSpec((1, H_pad), lambda i: (0, 0))
    w3_spec = pl.BlockSpec((depth, H_pad, H_pad), lambda i: (0, 0, 0))
    b3_spec = pl.BlockSpec((depth, 1, H_pad), lambda i: (0, 0, 0))
    out_spec = pl.BlockSpec((depth, TB, H_pad), lambda i: (0, i, 0))

    # VMEM budget: resident weights + (double-buffered) activation and output tiles.
    weight_bytes = 2 * E_pad * H_pad * 2 + 2 * depth * H_pad * H_pad * 2      # bf16
    bias_bytes = (2 + 2 * depth) * H_pad * 4                                  # f32
    act_bytes = 3 * TB * H_pad * 4                                            # x, s, ctx tile
    out_bytes = depth * TB * H_pad * 4
    vmem_needed = 2 * (weight_bytes + bias_bytes + act_bytes + out_bytes) + (4 << 20)
    vmem_limit = int(min(max(vmem_needed, 32 << 20), 64 << 20))
    # TODO(synk): if the bf16 w_cell slab ever overflows VMEM (very large h*depth, esp. on
    # v7x's 64 MiB), move w_cell to memory_space=pl.ANY and manually double-buffer per-depth
    # weight slabs with pltpu.make_async_copy (prefetch w_cell[l+1] while computing step l).

    s_all_p = pl.pallas_call(
        kernel,
        grid=(n_tiles,),
        out_shape=jax.ShapeDtypeStruct((depth, B_pad, H_pad), f32),
        in_specs=[tile_spec_e, tile_spec_h, tile_spec_e,
                  w2_spec, w2_spec, b2_spec, b2_spec,
                  w3_spec, w3_spec, b3_spec, b3_spec],
        out_specs=out_spec,
        compiler_params=pltpu.CompilerParams(
            dimension_semantics=("parallel",),
            vmem_limit_bytes=vmem_limit,
        ),
    )(x_p, s_p, ctx_p,
      w_in_h, w_in_t, b_in_h, b_in_t,
      wc_h, wc_t, bc_h, bc_t)

    s_all = s_all_p[:, :B, :h]
    s_out = [s_all[l] for l in range(depth)]
    s_final = s_out[-1]      # s_final == s_all[depth-1]; no redundant output buffer
    return s_final, s_final, s_out


def _reference(x, s, ctx, w_in, b_in, w_cell, b_cell, *, matmul_dtype=jnp.float32):
    """Pure-JAX reference mirroring the PyTorch forward (eval mode).

    matmul_dtype=bfloat16 emulates the kernel's bf16-operand / f32-accumulate matmuls.
    """
    _, embed_dim = x.shape
    h = s.shape[1]
    depth = w_cell.shape[0]
    md = matmul_dtype
    inp = jnp.dot(x.astype(md), w_in.astype(md),
                  preferred_element_type=jnp.float32) + b_in[0]
    outs = []
    for l in range(depth):
        pre = jnp.dot((s * ctx[:, :embed_dim]).astype(md), w_cell[l].astype(md),
                      preferred_element_type=jnp.float32) + b_cell[l]
        if l == 0:
            pre = pre + inp
        hh = jnp.tanh(pre[:, :h])
        tt = jax.nn.sigmoid(pre[:, h:])
        s = hh * tt + s * (1.0 - tt)
        outs.append(s)
    return s, outs


if __name__ == "__main__":
    # Small, TPU-friendly shapes consistent with the module.
    B = 4
    embed_dim = 32
    h = embed_dim          # required by the original elementwise multiply
    depth = 3
    gate_drop = 0.1        # unused: trainable=False => dropout is identity

    key = jax.random.PRNGKey(0)
    ks = jax.random.split(key, 7)

    # Deterministic parameter init mimicking nn.Linear's uniform(-1/sqrt(fan_in), +).
    bound_in = 1.0 / math.sqrt(embed_dim)
    w_in = jax.random.uniform(ks[0], (embed_dim, 2 * h), jnp.float32, -bound_in, bound_in)
    b_in = jax.random.uniform(ks[1], (1, 2 * h), jnp.float32, -bound_in, bound_in)
    bound_c = 1.0 / math.sqrt(h)
    w_cell = jax.random.uniform(ks[2], (depth, h, 2 * h), jnp.float32, -bound_c, bound_c)
    b_cell = jax.random.uniform(ks[3], (depth, 2 * h), jnp.float32, -bound_c, bound_c)

    x = jax.random.normal(ks[4], (B, embed_dim), jnp.float32)
    s0 = jax.random.normal(ks[5], (B, h), jnp.float32)
    ctx = jax.random.normal(ks[6], (B, embed_dim), jnp.float32)

    s_fin, s_fin2, s_out = rhn_context_cell(
        x, s0, ctx, w_in, b_in, w_cell, b_cell, trainable=False, gate_drop=gate_drop)
    jax.block_until_ready(s_fin)

    # Check 1: against a reference using the same bf16-operand / f32-accumulate matmuls.
    s_ref_bf, outs_ref_bf = _reference(x, s0, ctx, w_in, b_in, w_cell, b_cell,
                                       matmul_dtype=jnp.bfloat16)
    np.testing.assert_allclose(np.asarray(s_fin), np.asarray(s_ref_bf), rtol=2e-3, atol=2e-3)
    for a, b in zip(s_out, outs_ref_bf):
        np.testing.assert_allclose(np.asarray(a), np.asarray(b), rtol=2e-3, atol=2e-3)

    # Check 2: against the pure-f32 module semantics (loose tolerance for bf16 matmul inputs).
    s_ref_f32, _ = _reference(x, s0, ctx, w_in, b_in, w_cell, b_cell,
                              matmul_dtype=jnp.float32)
    np.testing.assert_allclose(np.asarray(s_fin), np.asarray(s_ref_f32), rtol=6e-2, atol=6e-2)

    print("KERNEL_OK")
</pallas_src>

<mosaic_0001>
module attributes {stable_mosaic.version = 11 : i64} {
  func.func @_rhn_context_kernel(%arg0: i32, %arg1: memref<8x128xf32, #tpu.memory_space<vmem>>, %arg2: memref<8x128xf32, #tpu.memory_space<vmem>>, %arg3: memref<8x128xf32, #tpu.memory_space<vmem>>, %arg4: memref<128x128xbf16, #tpu.memory_space<vmem>>, %arg5: memref<128x128xbf16, #tpu.memory_space<vmem>>, %arg6: memref<1x128xf32, #tpu.memory_space<vmem>>, %arg7: memref<1x128xf32, #tpu.memory_space<vmem>>, %arg8: memref<3x128x128xbf16, #tpu.memory_space<vmem>>, %arg9: memref<3x128x128xbf16, #tpu.memory_space<vmem>>, %arg10: memref<3x1x128xf32, #tpu.memory_space<vmem>>, %arg11: memref<3x1x128xf32, #tpu.memory_space<vmem>>, %arg12: memref<3x8x128xf32, #tpu.memory_space<vmem>>) attributes {dimension_semantics = [#tpu.dimension_semantics<parallel>], iteration_bounds = array<i64: 1>, scalar_prefetch = 0 : i64, scratch_operands = 0 : i64, tpu.core_type = #tpu.core_type<tc>, window_params = [{transform_indices = @transform_0, window_bounds = array<i64: 8, 128>}, {transform_indices = @transform_1, window_bounds = array<i64: 8, 128>}, {transform_indices = @transform_2, window_bounds = array<i64: 8, 128>}, {pipeline_mode = #tpu.pipeline_mode<synchronous>, transform_indices = @transform_3, window_bounds = array<i64: 128, 128>}, {pipeline_mode = #tpu.pipeline_mode<synchronous>, transform_indices = @transform_4, window_bounds = array<i64: 128, 128>}, {pipeline_mode = #tpu.pipeline_mode<synchronous>, transform_indices = @transform_5, window_bounds = array<i64: 1, 128>}, {pipeline_mode = #tpu.pipeline_mode<synchronous>, transform_indices = @transform_6, window_bounds = array<i64: 1, 128>}, {pipeline_mode = #tpu.pipeline_mode<synchronous>, transform_indices = @transform_7, window_bounds = array<i64: 3, 128, 128>}, {pipeline_mode = #tpu.pipeline_mode<synchronous>, transform_indices = @transform_8, window_bounds = array<i64: 3, 128, 128>}, {pipeline_mode = #tpu.pipeline_mode<synchronous>, transform_indices = @transform_9, window_bounds = array<i64: 3, 1, 128>}, {pipeline_mode = #tpu.pipeline_mode<synchronous>, transform_indices = @transform_10, window_bounds = array<i64: 3, 1, 128>}, {transform_indices = @transform_11, window_bounds = array<i64: 3, 8, 128>}]} {
    %c0 = arith.constant 0 : index
    %c0_0 = arith.constant 0 : index
    %0 = vector.load %arg1[%c0, %c0_0] : memref<8x128xf32, #tpu.memory_space<vmem>>, vector<8x128xf32>
    %1 = arith.truncf %0 : vector<8x128xf32> to vector<8x128xbf16>
    %c0_1 = arith.constant 0 : index
    %c0_2 = arith.constant 0 : index
    %2 = vector.load %arg2[%c0_1, %c0_2] : memref<8x128xf32, #tpu.memory_space<vmem>>, vector<8x128xf32>
    %c0_3 = arith.constant 0 : index
    %c0_4 = arith.constant 0 : index
    %3 = vector.load %arg3[%c0_3, %c0_4] : memref<8x128xf32, #tpu.memory_space<vmem>>, vector<8x128xf32>
    %c0_5 = arith.constant 0 : index
    %c0_6 = arith.constant 0 : index
    %4 = vector.load %arg4[%c0_5, %c0_6] : memref<128x128xbf16, #tpu.memory_space<vmem>>, vector<128x128xbf16>
    %cst = arith.constant dense<0.000000e+00> : vector<8x128xf32>
    %5 = tpu.matmul %1, %4, %cst {dimension_numbers = #tpu.dot_dimension_numbers<[1], [0], [0], [1], [0, 0, 1, 1], [], []>} : vector<8x128xbf16>, vector<128x128xbf16>, vector<8x128xf32> -> vector<8x128xf32>
    %c0_7 = arith.constant 0 : index
    %c0_8 = arith.constant 0 : index
    %6 = vector.load %arg6[%c0_7, %c0_8] : memref<1x128xf32, #tpu.memory_space<vmem>>, vector<1x128xf32>
    %7 = vector.broadcast %6 : vector<1x128xf32> to vector<8x128xf32>
    %8 = arith.addf %5, %7 : vector<8x128xf32>
    %c0_9 = arith.constant 0 : index
    %c0_10 = arith.constant 0 : index
    %9 = vector.load %arg5[%c0_9, %c0_10] : memref<128x128xbf16, #tpu.memory_space<vmem>>, vector<128x128xbf16>
    %cst_11 = arith.constant dense<0.000000e+00> : vector<8x128xf32>
    %10 = tpu.matmul %1, %9, %cst_11 {dimension_numbers = #tpu.dot_dimension_numbers<[1], [0], [0], [1], [0, 0, 1, 1], [], []>} : vector<8x128xbf16>, vector<128x128xbf16>, vector<8x128xf32> -> vector<8x128xf32>
    %c0_12 = arith.constant 0 : index
    %c0_13 = arith.constant 0 : index
    %11 = vector.load %arg7[%c0_12, %c0_13] : memref<1x128xf32, #tpu.memory_space<vmem>>, vector<1x128xf32>
    %12 = vector.broadcast %11 : vector<1x128xf32> to vector<8x128xf32>
    %13 = arith.addf %10, %12 : vector<8x128xf32>
    %14 = arith.mulf %2, %3 : vector<8x128xf32>
    %15 = arith.truncf %14 : vector<8x128xf32> to vector<8x128xbf16>
    %c0_14 = arith.constant 0 : index
    %c0_15 = arith.constant 0 : index
    %c0_16 = arith.constant 0 : index
    %16 = vector.load %arg8[%c0_14, %c0_15, %c0_16] : memref<3x128x128xbf16, #tpu.memory_space<vmem>>, vector<1x128x128xbf16>
    %17 = vector.shape_cast %16 : vector<1x128x128xbf16> to vector<128x128xbf16>
    %cst_17 = arith.constant dense<0.000000e+00> : vector<8x128xf32>
    %18 = tpu.matmul %15, %17, %cst_17 {dimension_numbers = #tpu.dot_dimension_numbers<[1], [0], [0], [1], [0, 0, 1, 1], [], []>} : vector<8x128xbf16>, vector<128x128xbf16>, vector<8x128xf32> -> vector<8x128xf32>
    %c0_18 = arith.constant 0 : index
    %c0_19 = arith.constant 0 : index
    %c0_20 = arith.constant 0 : index
    %19 = vector.load %arg10[%c0_18, %c0_19, %c0_20] : memref<3x1x128xf32, #tpu.memory_space<vmem>>, vector<1x1x128xf32>
    %20 = vector.shape_cast %19 : vector<1x1x128xf32> to vector<1x128xf32>
    %21 = vector.broadcast %20 : vector<1x128xf32> to vector<8x128xf32>
    %22 = arith.addf %18, %21 : vector<8x128xf32>
    %c0_21 = arith.constant 0 : index
    %c0_22 = arith.constant 0 : index
    %c0_23 = arith.constant 0 : index
    %23 = vector.load %arg9[%c0_21, %c0_22, %c0_23] : memref<3x128x128xbf16, #tpu.memory_space<vmem>>, vector<1x128x128xbf16>
    %24 = vector.shape_cast %23 : vector<1x128x128xbf16> to vector<128x128xbf16>
    %cst_24 = arith.constant dense<0.000000e+00> : vector<8x128xf32>
    %25 = tpu.matmul %15, %24, %cst_24 {dimension_numbers = #tpu.dot_dimension_numbers<[1], [0], [0], [1], [0, 0, 1, 1], [], []>} : vector<8x128xbf16>, vector<128x128xbf16>, vector<8x128xf32> -> vector<8x128xf32>
    %c0_25 = arith.constant 0 : index
    %c0_26 = arith.constant 0 : index
    %c0_27 = arith.constant 0 : index
    %26 = vector.load %arg11[%c0_25, %c0_26, %c0_27] : memref<3x1x128xf32, #tpu.memory_space<vmem>>, vector<1x1x128xf32>
    %27 = vector.shape_cast %26 : vector<1x1x128xf32> to vector<1x128xf32>
    %28 = vector.broadcast %27 : vector<1x128xf32> to vector<8x128xf32>
    %29 = arith.addf %25, %28 : vector<8x128xf32>
    %30 = arith.addf %22, %8 : vector<8x128xf32>
    %31 = arith.addf %29, %13 : vector<8x128xf32>
    %32 = math.tanh %30 : vector<8x128xf32>
    %33 = arith.negf %31 : vector<8x128xf32>
    %34 = math.exp %33 : vector<8x128xf32>
    %cst_28 = arith.constant 1.000000e+00 : f32
    %35 = vector.broadcast %cst_28 : f32 to vector<8x128xf32>
    %36 = arith.addf %35, %34 : vector<8x128xf32>
    %37 = arith.divf %35, %36 : vector<8x128xf32>
    %38 = arith.mulf %32, %37 : vector<8x128xf32>
    %cst_29 = arith.constant 1.000000e+00 : f32
    %39 = vector.broadcast %cst_29 : f32 to vector<8x128xf32>
    %40 = arith.subf %39, %37 : vector<8x128xf32>
    %41 = arith.mulf %2, %40 : vector<8x128xf32>
    %42 = arith.addf %38, %41 : vector<8x128xf32>
    %c0_30 = arith.constant 0 : index
    %c0_31 = arith.constant 0 : index
    %c0_32 = arith.constant 0 : index
    %43 = vector.load %arg12[%c0_30, %c0_31, %c0_32] : memref<3x8x128xf32, #tpu.memory_space<vmem>>, vector<1x8x128xf32>
    %44 = vector.shape_cast %43 : vector<1x8x128xf32> to vector<8x128xf32>
    %45 = vector.shape_cast %42 : vector<8x128xf32> to vector<1x8x128xf32>
    tpu.vector_store %arg12[%c0_30, %c0_31, %c0_32], %45 {strides = array<i32>} : memref<3x8x128xf32, #tpu.memory_space<vmem>>, vector<1x8x128xf32>,
    %46 = arith.mulf %42, %3 : vector<8x128xf32>
    %47 = arith.truncf %46 : vector<8x128xf32> to vector<8x128xbf16>
    %c1 = arith.constant 1 : index
    %c0_33 = arith.constant 0 : index
    %c0_34 = arith.constant 0 : index
    %48 = vector.load %arg8[%c1, %c0_33, %c0_34] : memref<3x128x128xbf16, #tpu.memory_space<vmem>>, vector<1x128x128xbf16>
    %49 = vector.shape_cast %48 : vector<1x128x128xbf16> to vector<128x128xbf16>
    %cst_35 = arith.constant dense<0.000000e+00> : vector<8x128xf32>
    %50 = tpu.matmul %47, %49, %cst_35 {dimension_numbers = #tpu.dot_dimension_numbers<[1], [0], [0], [1], [0, 0, 1, 1], [], []>} : vector<8x128xbf16>, vector<128x128xbf16>, vector<8x128xf32> -> vector<8x128xf32>
    %c1_36 = arith.constant 1 : index
    %c0_37 = arith.constant 0 : index
    %c0_38 = arith.constant 0 : index
    %51 = vector.load %arg10[%c1_36, %c0_37, %c0_38] : memref<3x1x128xf32, #tpu.memory_space<vmem>>, vector<1x1x128xf32>
    %52 = vector.shape_cast %51 : vector<1x1x128xf32> to vector<1x128xf32>
    %53 = vector.broadcast %52 : vector<1x128xf32> to vector<8x128xf32>
    %54 = arith.addf %50, %53 : vector<8x128xf32>
    %c1_39 = arith.constant 1 : index
    %c0_40 = arith.constant 0 : index
    %c0_41 = arith.constant 0 : index
    %55 = vector.load %arg9[%c1_39, %c0_40, %c0_41] : memref<3x128x128xbf16, #tpu.memory_space<vmem>>, vector<1x128x128xbf16>
    %56 = vector.shape_cast %55 : vector<1x128x128xbf16> to vector<128x128xbf16>
    %cst_42 = arith.constant dense<0.000000e+00> : vector<8x128xf32>
    %57 = tpu.matmul %47, %56, %cst_42 {dimension_numbers = #tpu.dot_dimension_numbers<[1], [0], [0], [1], [0, 0, 1, 1], [], []>} : vector<8x128xbf16>, vector<128x128xbf16>, vector<8x128xf32> -> vector<8x128xf32>
    %c1_43 = arith.constant 1 : index
    %c0_44 = arith.constant 0 : index
    %c0_45 = arith.constant 0 : index
    %58 = vector.load %arg11[%c1_43, %c0_44, %c0_45] : memref<3x1x128xf32, #tpu.memory_space<vmem>>, vector<1x1x128xf32>
    %59 = vector.shape_cast %58 : vector<1x1x128xf32> to vector<1x128xf32>
    %60 = vector.broadcast %59 : vector<1x128xf32> to vector<8x128xf32>
    %61 = arith.addf %57, %60 : vector<8x128xf32>
    %62 = math.tanh %54 : vector<8x128xf32>
    %63 = arith.negf %61 : vector<8x128xf32>
    %64 = math.exp %63 : vector<8x128xf32>
    %cst_46 = arith.constant 1.000000e+00 : f32
    %65 = vector.broadcast %cst_46 : f32 to vector<8x128xf32>
    %66 = arith.addf %65, %64 : vector<8x128xf32>
    %67 = arith.divf %65, %66 : vector<8x128xf32>
    %68 = arith.mulf %62, %67 : vector<8x128xf32>
    %cst_47 = arith.constant 1.000000e+00 : f32
    %69 = vector.broadcast %cst_47 : f32 to vector<8x128xf32>
    %70 = arith.subf %69, %67 : vector<8x128xf32>
    %71 = arith.mulf %42, %70 : vector<8x128xf32>
    %72 = arith.addf %68, %71 : vector<8x128xf32>
    %c1_48 = arith.constant 1 : index
    %c0_49 = arith.constant 0 : index
    %c0_50 = arith.constant 0 : index
    %73 = vector.load %arg12[%c1_48, %c0_49, %c0_50] : memref<3x8x128xf32, #tpu.memory_space<vmem>>, vector<1x8x128xf32>
    %74 = vector.shape_cast %73 : vector<1x8x128xf32> to vector<8x128xf32>
    %75 = vector.shape_cast %72 : vector<8x128xf32> to vector<1x8x128xf32>
    tpu.vector_store %arg12[%c1_48, %c0_49, %c0_50], %75 {strides = array<i32>} : memref<3x8x128xf32, #tpu.memory_space<vmem>>, vector<1x8x128xf32>,
    %76 = arith.mulf %72, %3 : vector<8x128xf32>
    %77 = arith.truncf %76 : vector<8x128xf32> to vector<8x128xbf16>
    %c2 = arith.constant 2 : index
    %c0_51 = arith.constant 0 : index
    %c0_52 = arith.constant 0 : index
    %78 = vector.load %arg8[%c2, %c0_51, %c0_52] : memref<3x128x128xbf16, #tpu.memory_space<vmem>>, vector<1x128x128xbf16>
    %79 = vector.shape_cast %78 : vector<1x128x128xbf16> to vector<128x128xbf16>
    %cst_53 = arith.constant dense<0.000000e+00> : vector<8x128xf32>
    %80 = tpu.matmul %77, %79, %cst_53 {dimension_numbers = #tpu.dot_dimension_numbers<[1], [0], [0], [1], [0, 0, 1, 1], [], []>} : vector<8x128xbf16>, vector<128x128xbf16>, vector<8x128xf32> -> vector<8x128xf32>
    %c2_54 = arith.constant 2 : index
    %c0_55 = arith.constant 0 : index
    %c0_56 = arith.constant 0 : index
    %81 = vector.load %arg10[%c2_54, %c0_55, %c0_56] : memref<3x1x128xf32, #tpu.memory_space<vmem>>, vector<1x1x128xf32>
    %82 = vector.shape_cast %81 : vector<1x1x128xf32> to vector<1x128xf32>
    %83 = vector.broadcast %82 : vector<1x128xf32> to vector<8x128xf32>
    %84 = arith.addf %80, %83 : vector<8x128xf32>
    %c2_57 = arith.constant 2 : index
    %c0_58 = arith.constant 0 : index
    %c0_59 = arith.constant 0 : index
    %85 = vector.load %arg9[%c2_57, %c0_58, %c0_59] : memref<3x128x128xbf16, #tpu.memory_space<vmem>>, vector<1x128x128xbf16>
    %86 = vector.shape_cast %85 : vector<1x128x128xbf16> to vector<128x128xbf16>
    %cst_60 = arith.constant dense<0.000000e+00> : vector<8x128xf32>
    %87 = tpu.matmul %77, %86, %cst_60 {dimension_numbers = #tpu.dot_dimension_numbers<[1], [0], [0], [1], [0, 0, 1, 1], [], []>} : vector<8x128xbf16>, vector<128x128xbf16>, vector<8x128xf32> -> vector<8x128xf32>
    %c2_61 = arith.constant 2 : index
    %c0_62 = arith.constant 0 : index
    %c0_63 = arith.constant 0 : index
    %88 = vector.load %arg11[%c2_61, %c0_62, %c0_63] : memref<3x1x128xf32, #tpu.memory_space<vmem>>, vector<1x1x128xf32>
    %89 = vector.shape_cast %88 : vector<1x1x128xf32> to vector<1x128xf32>
    %90 = vector.broadcast %89 : vector<1x128xf32> to vector<8x128xf32>
    %91 = arith.addf %87, %90 : vector<8x128xf32>
    %92 = math.tanh %84 : vector<8x128xf32>
    %93 = arith.negf %91 : vector<8x128xf32>
    %94 = math.exp %93 : vector<8x128xf32>
    %cst_64 = arith.constant 1.000000e+00 : f32
    %95 = vector.broadcast %cst_64 : f32 to vector<8x128xf32>
    %96 = arith.addf %95, %94 : vector<8x128xf32>
    %97 = arith.divf %95, %96 : vector<8x128xf32>
    %98 = arith.mulf %92, %97 : vector<8x128xf32>
    %cst_65 = arith.constant 1.000000e+00 : f32
    %99 = vector.broadcast %cst_65 : f32 to vector<8x128xf32>
    %100 = arith.subf %99, %97 : vector<8x128xf32>
    %101 = arith.mulf %72, %100 : vector<8x128xf32>
    %102 = arith.addf %98, %101 : vector<8x128xf32>
    %c2_66 = arith.constant 2 : index
    %c0_67 = arith.constant 0 : index
    %c0_68 = arith.constant 0 : index
    %103 = vector.load %arg12[%c2_66, %c0_67, %c0_68] : memref<3x8x128xf32, #tpu.memory_space<vmem>>, vector<1x8x128xf32>
    %104 = vector.shape_cast %103 : vector<1x8x128xf32> to vector<8x128xf32>
    %105 = vector.shape_cast %102 : vector<8x128xf32> to vector<1x8x128xf32>
    tpu.vector_store %arg12[%c2_66, %c0_67, %c0_68], %105 {strides = array<i32>} : memref<3x8x128xf32, #tpu.memory_space<vmem>>, vector<1x8x128xf32>,
    return
  }
  func.func @transform_0(%arg0: i32) -> (i32, i32) {
    %c0_i32 = arith.constant 0 : i32
    %c0_i32_0 = arith.constant 0 : i32
    return %arg0, %c0_i32 : i32, i32
  }
  func.func @transform_1(%arg0: i32) -> (i32, i32) {
    %c0_i32 = arith.constant 0 : i32
    %c0_i32_0 = arith.constant 0 : i32
    return %arg0, %c0_i32 : i32, i32
  }
  func.func @transform_2(%arg0: i32) -> (i32, i32) {
    %c0_i32 = arith.constant 0 : i32
    %c0_i32_0 = arith.constant 0 : i32
    return %arg0, %c0_i32 : i32, i32
  }
  func.func @transform_3(%arg0: i32) -> (i32, i32) {
    %c0_i32 = arith.constant 0 : i32
    %c0_i32_0 = arith.constant 0 : i32
    %c0_i32_1 = arith.constant 0 : i32
    return %c0_i32, %c0_i32_0 : i32, i32
  }
  func.func @transform_4(%arg0: i32) -> (i32, i32) {
    %c0_i32 = arith.constant 0 : i32
    %c0_i32_0 = arith.constant 0 : i32
    %c0_i32_1 = arith.constant 0 : i32
    return %c0_i32, %c0_i32_0 : i32, i32
  }
  func.func @transform_5(%arg0: i32) -> (i32, i32) {
    %c0_i32 = arith.constant 0 : i32
    %c0_i32_0 = arith.constant 0 : i32
    %c0_i32_1 = arith.constant 0 : i32
    return %c0_i32, %c0_i32_0 : i32, i32
  }
  func.func @transform_6(%arg0: i32) -> (i32, i32) {
    %c0_i32 = arith.constant 0 : i32
    %c0_i32_0 = arith.constant 0 : i32
    %c0_i32_1 = arith.constant 0 : i32
    return %c0_i32, %c0_i32_0 : i32, i32
  }
  func.func @transform_7(%arg0: i32) -> (i32, i32, i32) {
    %c0_i32 = arith.constant 0 : i32
    %c0_i32_0 = arith.constant 0 : i32
    %c0_i32_1 = arith.constant 0 : i32
    %c0_i32_2 = arith.constant 0 : i32
    return %c0_i32, %c0_i32_0, %c0_i32_1 : i32, i32, i32
  }
  func.func @transform_8(%arg0: i32) -> (i32, i32, i32) {
    %c0_i32 = arith.constant 0 : i32
    %c0_i32_0 = arith.constant 0 : i32
    %c0_i32_1 = arith.constant 0 : i32
    %c0_i32_2 = arith.constant 0 : i32
    return %c0_i32, %c0_i32_0, %c0_i32_1 : i32, i32, i32
  }
  func.func @transform_9(%arg0: i32) -> (i32, i32, i32) {
    %c0_i32 = arith.constant 0 : i32
    %c0_i32_0 = arith.constant 0 : i32
    %c0_i32_1 = arith.constant 0 : i32
    %c0_i32_2 = arith.constant 0 : i32
    return %c0_i32, %c0_i32_0, %c0_i32_1 : i32, i32, i32
  }
  func.func @transform_10(%arg0: i32) -> (i32, i32, i32) {
    %c0_i32 = arith.constant 0 : i32
    %c0_i32_0 = arith.constant 0 : i32
    %c0_i32_1 = arith.constant 0 : i32
    %c0_i32_2 = arith.constant 0 : i32
    return %c0_i32, %c0_i32_0, %c0_i32_1 : i32, i32, i32
  }
  func.func @transform_11(%arg0: i32) -> (i32, i32, i32) {
    %c0_i32 = arith.constant 0 : i32
    %c0_i32_0 = arith.constant 0 : i32
    %c0_i32_1 = arith.constant 0 : i32
    return %c0_i32, %arg0, %c0_i32_0 : i32, i32, i32
  }
}

</mosaic_0001>

<bundles_post_ra>
// kernel: tpu_custom_call.1
= control target key start
LH: loop header
LB: loop body
LE: loop exit
PB: predicated region body
PF: predicated region fallthrough
CT: control target
= control target key end

     0   :  { %16 = vsyncpa [#allocation3], 0  ;;  %s1704_s0 = inlined_call_operand.hbm [shape: f32[8,128], index: 0, kind: input, shape index: {}]   ;;  %s1705_s1 = inlined_call_operand.hbm [shape: f32[8,128], index: 1, kind: input, shape index: {}]   ;;  %s1706_s2 = inlined_call_operand.hbm [shape: f32[8,128], index: 2, kind: input, shape index: {}]   ;;  %s1707_s3 = inlined_call_operand.hbm [shape: bf16[128,128], index: 3, kind: input, shape index: {}]   ;;  %s1708_s4 = inlined_call_operand.hbm [shape: bf16[128,128], index: 4, kind: input, shape index: {}]   ;;  %s1709_s5 = inlined_call_operand.hbm [shape: f32[1,128], index: 5, kind: input, shape index: {}]   ;;  %s1710_s6 = inlined_call_operand.hbm [shape: f32[1,128], index: 6, kind: input, shape index: {}]   ;;  %s1711_s7 = inlined_call_operand.hbm [shape: bf16[3,128,128], index: 7, kind: input, shape index: {}]   ;;  %s1712_s8 = inlined_call_operand.hbm [shape: bf16[3,128,128], index: 8, kind: input, shape index: {}]   ;;  %s1713_s9 = inlined_call_operand.vmem [shape: f32[3,1,128], index: 9, kind: input, shape index: {}]   ;;  %s1714_s10 = inlined_call_operand.vmem [shape: f32[3,1,128], index: 10, kind: input, shape index: {}]   ;;  %s1715_s11 = inlined_call_operand.hbm [shape: f32[3,8,128], index: 11, kind: output, shape index: {}]  }
   0x1   :  { %17 = vsyncpa [#allocation6], 0 }
   0x2   :  { %18 = vsyncpa [#allocation9], 0 }
   0x3   :  { %19 = vsyncpa [#allocation12], 0 }
   0x4   :  { %20 = vsyncpa [#allocation15], 0  ;;  %s38_s19 = sshll.u32 %s1705_s1, 4  ;;  %s39_s19 = int_to_ptr.hbm [resolvable:$true] %s38_s19 }
   0x5   :  { %21 = vsyncpa [#allocation4], 0  ;;  %s1556_s20 = smov [#allocation5]   ;;  %s59_s24 = sshll.u32 %s1707_s3, 4  ;;  %s60_s24 = int_to_ptr.hbm [resolvable:$true] %s59_s24 }
   0x6   :  { %s40_s21 = sshll.u32 %s1556_s20, 4  ;;  %s1557_s25 = smov [#allocation8]   ;;  %s41_s21 = int_to_ptr.vmem [resolvable:$true] %s40_s21 }
   0x7   :  { %43 = dma.hbm_to_vmem [thread:$0]  %s39_s19, 128, %s41_s21, [#allocation6]  }
   0x8   :  { %s61_s26 = sshll.u32 %s1557_s25, 4  ;;  %s1558_s27 = smov 64   ;;  %s62_s26 = int_to_ptr.vmem [resolvable:$true] %s61_s26 }
   0x9   :  { %s1559_s28 = smov 4   ;;  %s86_s30 = sshll.u32 %s1709_s5, 4  ;;  %s87_s30 = int_to_ptr.hbm [resolvable:$true] %s86_s30 }
   0xa   :  { %67 = dma.hbm_to_vmem [thread:$0]  %s60_s24, 1024, %s62_s26, [#allocation9], %s1558_s27, %s1558_s27, %s1559_s28  }
   0xb   :  { %s1560_s12 = smov [#allocation11]   ;;  %s107_s15 = sshll.u32 %s1711_s7, 4  ;;  %s108_s15 = int_to_ptr.hbm [resolvable:$true] %s107_s15 }
   0xc   :  { %s88_s13 = sshll.u32 %s1560_s12, 4  ;;  %s1561_s16 = smov [#allocation14]   ;;  %s89_s13 = int_to_ptr.vmem [resolvable:$true] %s88_s13 }
   0xd   :  { %91 = dma.hbm_to_vmem [thread:$0]  %s87_s30, 16, %s89_s13, [#allocation12]  }
   0xe   :  { %s109_s17 = sshll.u32 %s1561_s16, 4  ;;  %s27_s20 = sshll.u32 %s1704_s0, 4  ;;  %s110_s17 = int_to_ptr.vmem [resolvable:$true] %s109_s17  ;;  %s28_s20 = int_to_ptr.hbm [resolvable:$true] %s27_s20 }
   0xf   :  { %115 = dma.hbm_to_vmem [thread:$0]  %s108_s15, 3072, %s110_s17, [#allocation15], %s1558_s27, %s1558_s27, %s1559_s28  }
  0x10   :  { %s49_s22 = sshll.u32 %s1706_s2, 4  ;;  %s1562_s23 = smov [#allocation2]   ;;  %s50_s22 = int_to_ptr.hbm [resolvable:$true] %s49_s22 }
  0x11   :  { %s29_s7 = sshll.u32 %s1562_s23, 4  ;;  %s1563_s24 = smov [#allocation7]   ;;  %s30_s7 = int_to_ptr.vmem [resolvable:$true] %s29_s7 }
  0x12   :  { %32 = dma.hbm_to_vmem [thread:$0]  %s28_s20, 128, %s30_s7, [#allocation3]  }
  0x13   :  { %s51_s25 = sshll.u32 %s1563_s24, 4  ;;  %s72_s0 = sshll.u32 %s1708_s4, 4  ;;  %s52_s25 = int_to_ptr.vmem [resolvable:$true] %s51_s25  ;;  %s73_s0 = int_to_ptr.hbm [resolvable:$true] %s72_s0 }
  0x14   :  { %54 = dma.hbm_to_vmem [thread:$0]  %s50_s22, 128, %s52_s25, [#allocation6]  }
  0x15   :  { %s97_s12 = sshll.u32 %s1710_s6, 4  ;;  %s1564_s13 = smov [#allocation10]   ;;  %s98_s12 = int_to_ptr.hbm [resolvable:$true] %s97_s12 }
  0x16   :  { %s74_s2 = sshll.u32 %s1564_s13, 4  ;;  %s1565_s3 = smov [#allocation13]   ;;  %s75_s2 = int_to_ptr.vmem [resolvable:$true] %s74_s2 }
  0x17   :  { %80 = dma.hbm_to_vmem [thread:$0]  %s73_s0, 1024, %s75_s2, [#allocation9], %s1558_s27, %s1558_s27, %s1559_s28  }
  0x18   :  { %s99_s14 = sshll.u32 %s1565_s3, 4  ;;  %s120_s4 = sshll.u32 %s1712_s8, 4  ;;  %s100_s14 = int_to_ptr.vmem [resolvable:$true] %s99_s14  ;;  %s121_s4 = int_to_ptr.hbm [resolvable:$true] %s120_s4 }
  0x19   :  { %102 = dma.hbm_to_vmem [thread:$0]  %s98_s12, 16, %s100_s14, [#allocation12]  }
  0x1a   :  { %s1566_s17 = smov [#allocation16]  }
  0x1b   :  { %s122_s18 = sshll.u32 %s1566_s17, 4  ;;  %s123_s18 = int_to_ptr.vmem [resolvable:$true] %s122_s18 }
  0x1c   :  { %128 = dma.hbm_to_vmem [thread:$0]  %s121_s4, 3072, %s123_s18, [#allocation15], %s1558_s27, %s1558_s27, %s1559_s28  }
  0x1d   :  { %1544 = dma.done.wait [#allocation3], 128  }
  0x1e   :  { %1545 = vsyncadd [#allocation3], 4294967168 }
  0x1f   :  { %1546 = dma.done.wait [#allocation6], 256  }
  0x20   :  { %1547 = vsyncadd [#allocation6], 4294967040 }
  0x21   :  { %1548 = dma.done.wait [#allocation9], 2048  }
  0x22   :  { %1549 = vsyncadd [#allocation9], 4294965248 }
  0x23   :  { %1550 = dma.done.wait [#allocation12], 32  }
  0x24   :  { %1551 = vsyncadd [#allocation12], 4294967264 }
  0x25   :  { %1552 = dma.done.wait [#allocation15], 6144  }
  0x26   :  { %1553 = vsyncadd [#allocation15], 4294961152  ;;  %v1215_v0 = vld [vmem:[#allocation10 + $0x38] sm:$0xff]  ;;  %v1214_v2 = vld [vmem:[#allocation10 + $0x30] sm:$0xff]  ;;  %s920_s1 = sshll.u32 %s1715_s11, 4  ;;  %s1568_s0 = smov 128   ;;  %s921_s1 = int_to_ptr.hbm [resolvable:$true] %s920_s1 }
  0x27   :  { %v1231_v1 = vld [vmem:[#allocation16 + $0x38] sm:$0xff]  ;;  %322 = vmatpush.bf16.msra.mxu1 %v1215_v0  ;;  %v1230_v3 = vld [vmem:[#allocation16 + $0x30] sm:$0xff]  ;;  %v1213_v7 = vld [vmem:[#allocation10 + $0x28] sm:$0xff]  ;;  %s1569_s29 = smov 8  }
  0x28   :  { %486 = vmatpush.bf16.msra.mxu3 %v1231_v1  ;;  %v1223_v4 = vld [vmem:[#allocation14 + $0x38] sm:$0xff]  ;;  %v1222_v5 = vld [vmem:[#allocation14 + $0x30] sm:$0xff]  ;;  %v1229_v8 = vld [vmem:[#allocation16 + $0x28] sm:$0xff] }
  0x29   :  { %405 = vmatpush.bf16.msra.mxu2 %v1223_v4  ;;  %v1207_v6 = vld [vmem:[#allocation8 + $0x38] sm:$0xff]  ;;  %v1206_v9 = vld [vmem:[#allocation8 + $0x30] sm:$0xff]  ;;  %v1212_v11 = vld [vmem:[#allocation10 + $0x20] sm:$0xff] }
  0x2a   :  { %241 = vmatpush.bf16.msra.mxu0 %v1207_v6  ;;  %v1221_v10 = vld [vmem:[#allocation14 + $0x28] sm:$0xff]  ;;  %v1228_v12 = vld [vmem:[#allocation16 + $0x20] sm:$0xff]  ;;  %v1211_v14 = vld [vmem:[#allocation10 + $0x18] sm:$0xff] }
  0x2b   :  { %323 = vmatpush.bf16.msra.mxu1 %v1214_v2  ;;  %v1205_v13 = vld [vmem:[#allocation8 + $0x28] sm:$0xff]  ;;  %v1227_v16 = vld [vmem:[#allocation16 + $0x18] sm:$0xff]  ;;  %v1210_v19 = vld [vmem:[#allocation10 + $0x10] sm:$0xff] }
  0x2c   :  { %487 = vmatpush.bf16.msra.mxu3 %v1230_v3  ;;  %v1220_v15 = vld [vmem:[#allocation14 + $0x20] sm:$0xff]  ;;  %v1219_v18 = vld [vmem:[#allocation14 + $0x18] sm:$0xff]  ;;  %v1226_v20 = vld [vmem:[#allocation16 + $0x10] sm:$0xff] }
  0x2d   :  { %406 = vmatpush.bf16.msra.mxu2 %v1222_v5  ;;  %v1204_v17 = vld [vmem:[#allocation8 + $0x20] sm:$0xff]  ;;  %v1203_v21 = vld [vmem:[#allocation8 + $0x18] sm:$0xff]  ;;  %v1209_v23 = vld [vmem:[#allocation10 + $0x8] sm:$0xff] }
  0x2e   :  { %242 = vmatpush.bf16.msra.mxu0 %v1206_v9  ;;  %v1218_v22 = vld [vmem:[#allocation14 + $0x10] sm:$0xff]  ;;  %v1225_v24 = vld [vmem:[#allocation16 + $0x8] sm:$0xff]  ;;  %v1208_v30 = vld [vmem:[#allocation10] sm:$0xff] }
  0x2f   :  { %324 = vmatpush.bf16.msra.mxu1 %v1213_v7  ;;  %v1669_v25 = vld [vmem:[#allocation5] sm:$0xff]  ;;  %v1671_v26 = vld [vmem:[#allocation7] sm:$0xff]  ;;  %v1224_v31 = vld [vmem:[#allocation16] sm:$0xff] }
  0x30   :  { %488 = vmatpush.bf16.msra.mxu3 %v1229_v8  ;;  %v1202_v27 = vld [vmem:[#allocation8 + $0x10] sm:$0xff]  ;;  %v335_v29 = vmul.f32 %v1671_v26, %v1669_v25  ;;  %v169_v32 = vld [vmem:[#allocation2] sm:$0xff]  ;;  %v1200_v37 = vld [vmem:[#allocation8] sm:$0xff] }
  0x31   :  { %407 = vmatpush.bf16.msra.mxu2 %v1221_v10  ;;  %v1217_v28 = vld [vmem:[#allocation14 + $0x8] sm:$0xff]  ;;  %v1216_v34 = vld [vmem:[#allocation14] sm:$0xff]  ;;  %v170_v35 = vpack.c.bf16 %v169_v32, %v169_v32  ;;  %v1239_v38 = vld [vmem:[#allocation14 + $0x78] sm:$0xff] }
  0x32   :  { %243 = vmatpush.bf16.msra.mxu0 %v1205_v13  ;;  %v1201_v33 = vld [vmem:[#allocation8 + $0x8] sm:$0xff]  ;;  %v336_v36 = vpack.c.bf16 %v335_v29, %v335_v29  ;;  %v1247_v39 = vld [vmem:[#allocation16 + $0x78] sm:$0xff]  ;;  %v1238_v40 = vld [vmem:[#allocation14 + $0x70] sm:$0xff] }
  0x33   :  { %325 = vmatpush.bf16.msra.mxu1 %v1212_v11  ;;  %v1246_v41 = vld [vmem:[#allocation16 + $0x70] sm:$0xff]  ;;  %v1237_v42 = vld [vmem:[#allocation14 + $0x68] sm:$0xff]  ;;  %v1236_v44 = vld [vmem:[#allocation14 + $0x60] sm:$0xff] }
  0x34   :  { %489 = vmatpush.bf16.msra.mxu3 %v1228_v12  ;;  %v1245_v43 = vld [vmem:[#allocation16 + $0x68] sm:$0xff]  ;;  %v1244_v45 = vld [vmem:[#allocation16 + $0x60] sm:$0xff]  ;;  %v1235_v47 = vld [vmem:[#allocation14 + $0x58] sm:$0xff] }
  0x35   :  { %408 = vmatpush.bf16.msra.mxu2 %v1220_v15  ;;  %v1243_v48 = vld [vmem:[#allocation16 + $0x58] sm:$0xff]  ;;  %v1279_v50 = vld [vmem:[%s1714_s10] ss:$0 sm:$0xff]  ;;  %v1234_v51 = vld [vmem:[#allocation14 + $0x50] sm:$0xff] }
  0x36   :  { %244 = vmatpush.bf16.msra.mxu0 %v1204_v17  ;;  %v1278_v49 = vld [vmem:[#allocation13] ss:$0 sm:$0xff]  ;;  %v1242_v52 = vld [vmem:[#allocation16 + $0x50] sm:$0xff]  ;;  %v1233_v57 = vld [vmem:[#allocation14 + $0x48] sm:$0xff] }
  0x37   :  { %326 = vmatpush.bf16.msra.mxu1 %v1211_v14  ;;  %v1241_v58 = vld [vmem:[#allocation16 + $0x48] sm:$0xff]  ;;  %v1232_v62 = vld [vmem:[#allocation14 + $0x40] sm:$0xff]  ;;  %v1280_v6 = vld [vmem:[#allocation11] ss:$0 sm:$0xff] }
  0x38   :  { %490 = vmatpush.bf16.msra.mxu3 %v1227_v16  ;;  %v1240_v63 = vld [vmem:[#allocation16 + $0x40] sm:$0xff]  ;;  %v1254_v32 = vld [vmem:[#allocation14 + $0xb0] sm:$0xff] }
  0x39   :  { %409 = vmatpush.bf16.msra.mxu2 %v1219_v18  ;;  %v1281_v7 = vld [vmem:[%s1713_s9] ss:$0 sm:$0xff] }
  0x3a   :  { %245 = vmatpush.bf16.msra.mxu0 %v1203_v21 }
  0x3b   :  { %327 = vmatpush.bf16.msra.mxu1 %v1210_v19 }
  0x3c   :  { %491 = vmatpush.bf16.msra.mxu3 %v1226_v20 }
  0x3d   :  { %410 = vmatpush.bf16.msra.mxu2 %v1218_v22 }
  0x3e   :  { %246 = vmatpush.bf16.msra.mxu0 %v1202_v27 }
  0x3f   :  { %328 = vmatpush.bf16.msra.mxu1 %v1209_v23 }
  0x40   :  { %492 = vmatpush.bf16.msra.mxu3 %v1225_v24 }
  0x41   :  { %411 = vmatpush.bf16.msra.mxu2 %v1217_v28 }
  0x42   :  { %247 = vmatpush.bf16.msra.mxu0 %v1201_v33  ;;  %v1262_v33 = vld [vmem:[#allocation16 + $0xb0] sm:$0xff] }
  0x43   :  { %329 = vmatpush.bf16.msra.mxu1 %v1208_v30  ;;  %v1255_v30 = vld [vmem:[#allocation14 + $0xb8] sm:$0xff] }
  0x44   :  { %493 = vmatpush.bf16.msra.mxu3 %v1224_v31  ;;  %v1263_v31 = vld [vmem:[#allocation16 + $0xb8] sm:$0xff] }
  0x45   :  { %412 = vmatpush.bf16.msra.mxu2 %v1216_v34  ;;  %v1253_v34 = vld [vmem:[#allocation14 + $0xa8] sm:$0xff] }
  0x46   :  { %330 = vmatmul.bf16.vlgmr.msra.gmra.mxu1 %v170_v35  ;;  %248 = vmatpush.bf16.msra.mxu0 %v1200_v37  ;;  %v1251_v37 = vld [vmem:[#allocation14 + $0x98] sm:$0xff] }
  0x47   :  { %494 = vmatmul.bf16.vlgmr.msra.gmra.mxu3 %v336_v36  ;;  %681 = vmatpush.bf16.msrb.mxu1 %v1247_v39  ;;  %v1250_v39 = vld [vmem:[#allocation14 + $0x90] sm:$0xff] }
  0x48   :  { %413 = vmatmul.bf16.vlgmr.msra.gmra.mxu2 %v336_v36  ;;  %875 = vmatpush.bf16.msrb.mxu3 %v1263_v31  ;;  %v1260_v36 = vld [vmem:[#allocation16 + $0xa0] sm:$0xff] }
  0x49   :  { %249 = vmatmul.bf16.vlgmr.msra.gmra.mxu0 %v170_v35  ;;  %792 = vmatpush.bf16.msrb.mxu2 %v1255_v30  ;;  %v1252_v35 = vld [vmem:[#allocation14 + $0xa0] sm:$0xff] }
  0x4a   :  { %598 = vmatpush.bf16.msrb.mxu0 %v1239_v38  ;;  %v1259_v38 = vld [vmem:[#allocation16 + $0x98] sm:$0xff] }
  0x4b   :  { %682 = vmatpush.bf16.msrb.mxu1 %v1246_v41  ;;  %v1283_v41 = vld [vmem:[%s1714_s10 + $0x1] ss:$0 sm:$0xff] }
  0x4c   :  { %876 = vmatpush.bf16.msrb.mxu3 %v1262_v33 }
  0x4d   :  { %793 = vmatpush.bf16.msrb.mxu2 %v1254_v32 }
  0x4e   :  { %599 = vmatpush.bf16.msrb.mxu0 %v1238_v40  ;;  %v1258_v40 = vld [vmem:[#allocation16 + $0x90] sm:$0xff] }
  0x4f   :  { %683 = vmatpush.bf16.msrb.mxu1 %v1245_v43  ;;  %v1257_v43 = vld [vmem:[#allocation16 + $0x88] sm:$0xff] }
  0x51   :  { %794 = vmatpush.bf16.msrb.mxu2 %v1253_v34 }
  0x52   :  { %600 = vmatpush.bf16.msrb.mxu0 %v1237_v42  ;;  %v1249_v42 = vld [vmem:[#allocation14 + $0x88] sm:$0xff] }
  0x53   :  { %684 = vmatpush.bf16.msrb.mxu1 %v1244_v45 }
  0x55   :  { %795 = vmatpush.bf16.msrb.mxu2 %v1252_v35 }
  0x56   :  { %601 = vmatpush.bf16.msrb.mxu0 %v1236_v44 }
  0x57   :  { %685 = vmatpush.bf16.msrb.mxu1 %v1243_v48  ;;  %v1256_v48 = vld [vmem:[#allocation16 + $0x80] sm:$0xff] }
  0x59   :  { %796 = vmatpush.bf16.msrb.mxu2 %v1251_v37 }
  0x5a   :  { %602 = vmatpush.bf16.msrb.mxu0 %v1235_v47  ;;  %v1248_v47 = vld [vmem:[#allocation14 + $0x80] sm:$0xff] }
  0x5b   :  { %686 = vmatpush.bf16.msrb.mxu1 %v1242_v52 }
  0x5d   :  { %797 = vmatpush.bf16.msrb.mxu2 %v1250_v39 }
  0x5e   :  { %603 = vmatpush.bf16.msrb.mxu0 %v1234_v51 }
  0x5f   :  { %687 = vmatpush.bf16.msrb.mxu1 %v1241_v58 }
  0x61   :  { %798 = vmatpush.bf16.msrb.mxu2 %v1249_v42 }
  0x62   :  { %604 = vmatpush.bf16.msrb.mxu0 %v1233_v57 }
  0x63   :  { %688 = vmatpush.bf16.msrb.mxu1 %v1240_v63 }
  0x65   :  { %799 = vmatpush.bf16.msrb.mxu2 %v1248_v47 }
  0x66   :  { %605 = vmatpush.bf16.msrb.mxu0 %v1232_v62 }
  0xc3   :  { %v331_v46 = vpop.f32.mrf.mxu1 }
  0xc4   :  { %v332_v53 = vadd.f32 %v1278_v49, %v331_v46 }
  0xc6   :  { %v250_v54 = vpop.f32.mrf.mxu0 }
  0xc7   :  { %v251_v8 = vadd.f32 %v1280_v6, %v250_v54  ;;  %v1282_v54 = vld [vmem:[%s1713_s9 + $0x1] ss:$0 sm:$0xff] }
  0xca   :  { %v495_v55 = vpop.f32.mrf.mxu3 }
  0xcb   :  { %v496_v56 = vadd.f32 %v1279_v50, %v495_v55  ;;  %v333_v59 = vpop.f32.mrf.mxu1  ;;  %v414_v60 = vpop.f32.mrf.mxu2 }
  0xcc   :  { %v415_v9 = vadd.f32 %v1281_v7, %v414_v60 }
  0xcd   :  { %v500_v61 = vadd.f32 %v496_v56, %v332_v53 }
  0xce   :  { %v252_v1 = vpop.f32.mrf.mxu0  ;;  %v499_v11 = vadd.f32 %v415_v9, %v251_v8  ;;  %v1285_v9 = vld [vmem:[%s1714_s10 + $0x2] ss:$0 sm:$0xff]  ;;  %s1567_s10 = smov [#allocation17]  }
  0xcf   :  { %v1065_v0 = vmul.f32 -1.442695, %v500_v61  ;;  %s918_s25 = sshll.u32 %s1567_s10, 4  ;;  %s919_s25 = int_to_ptr.vmem [resolvable:$true] %s918_s25 }
  0xd1   :  { %1286 = vpow2.f32 %v1065_v0 }
  0xd2   :  { %v497_v2 = vpop.f32.mrf.mxu3 }
  0xd3   :  { %v416_v3 = vpop.f32.mrf.mxu2 }
  0xd7   :  { %v1287_v4 = vpop.eup %1286 }
  0xd8   :  { %v505_v5 = vadd.f32 1.0, %v1287_v4 }
  0xda   :  { %1288 = vrcp.f32 %v505_v5  ;;  %v517_v14 = vand.u32 2147483648, %v505_v5  ;;  %v515_v16 = vand.u32 2147483647, %v505_v5  ;;  %vm511_vm1 = vweird.f32 %v505_v5 }
  0xdb   :  { %1290 = vtanh.f32 %v499_v11 }
  0xdc   :  { %v518_v18 = vor.u32 1.1754944e-38, %v517_v14  ;;  %vm516_vm3 = vcmp.eq.f32.partialorder %v515_v16, 8.507059e+37 }
  0xe0   :  { %v1289_v10 = vpop.eup %1288 }
  0xe1   :  { %v507_v12 = vmul.f32 %v1289_v10, %v505_v5  ;;  %vm512_vm0 = vweird.f32 %v1289_v10  ;;  %v1291_v20 = vpop.eup %1290 }
  0xe2   :  { %vm513_vm2 = vmor %vm511_vm1, %vm512_vm0 }
  0xe3   :  { %v508_v13 = vsub.f32 1.0, %v507_v12 }
  0xe5   :  { %v509_v15 = vmul.f32 %v1289_v10, %v508_v13 }
  0xe7   :  { %v510_v17 = vadd.f32 %v1289_v10, %v509_v15 }
  0xe9   :  { %v514_v19 = vsel %vm513_vm2, %v1289_v10, %v510_v17 }
  0xea   :  { %v519_v21 = vsel %vm516_vm3, %v518_v18, %v514_v19 }
  0xeb   :  { %v522_v22 = vsub.f32 1.0, %v519_v21  ;;  %v521_v23 = vmul.f32 %v1291_v20, %v519_v21 }
  0xed   :  { %v523_v24 = vmul.f32 %v522_v22, %v1669_v25  ;;  %v1261_v25 = vld [vmem:[#allocation16 + $0xa8] sm:$0xff] }
  0xee   :  { %877 = vmatpush.bf16.msrb.mxu3 %v1261_v25 }
  0xef   :  { %v1682_v27 = vadd.f32 %v523_v24, %v521_v23 }
  0xf1   :  { %525 = vst [vmem:[#allocation17] sm:$0xff] %v1682_v27  ;;  %v526_v28 = vmul.f32 %v1682_v27, %v1671_v26 }
  0xf2   :  { %878 = vmatpush.bf16.msrb.mxu3 %v1260_v36 }
  0xf3   :  { %v527_v29 = vpack.c.bf16 %v526_v28, %v526_v28 }
  0xf5   :  { %606 = vmatmul.bf16.vlgmr.msrb.gmra.mxu0 %v527_v29  ;;  %689 = vmatmul.bf16.vlgmr.msrb.gmra.mxu1 %v527_v29 }
  0xf6   :  { %879 = vmatpush.bf16.msrb.mxu3 %v1259_v38 }
  0xfa   :  { %880 = vmatpush.bf16.msrb.mxu3 %v1258_v40 }
  0xfe   :  { %881 = vmatpush.bf16.msrb.mxu3 %v1257_v43 }
 0x102   :  { %882 = vmatpush.bf16.msrb.mxu3 %v1256_v48 }
 0x172   :  { %v607_v44 = vpop.f32.mrf.mxu0  ;;  %v690_v45 = vpop.f32.mrf.mxu1 }
 0x173   :  { %v691_v46 = vadd.f32 %v1283_v41, %v690_v45  ;;  %v608_v57 = vadd.f32 %v1282_v54, %v607_v44 }
 0x175   :  { %v1132_v49 = vmul.f32 -1.442695, %v691_v46 }
 0x177   :  { %1292 = vpow2.f32 %v1132_v49 }
 0x17a   :  { %v609_v50 = vpop.f32.mrf.mxu0  ;;  %v692_v51 = vpop.f32.mrf.mxu1 }
 0x17d   :  { %v1293_v52 = vpop.eup %1292 }
 0x17e   :  { %v698_v53 = vadd.f32 1.0, %v1293_v52 }
 0x180   :  { %1294 = vrcp.f32 %v698_v53  ;;  %v710_v59 = vand.u32 2147483648, %v698_v53  ;;  %v708_v61 = vand.u32 2147483647, %v698_v53  ;;  %vm704_vm5 = vweird.f32 %v698_v53 }
 0x181   :  { %1296 = vtanh.f32 %v608_v57 }
 0x182   :  { %v711_v63 = vor.u32 1.1754944e-38, %v710_v59  ;;  %vm709_vm7 = vcmp.eq.f32.partialorder %v708_v61, 8.507059e+37 }
 0x186   :  { %v1295_v55 = vpop.eup %1294 }
 0x187   :  { %v700_v56 = vmul.f32 %v1295_v55, %v698_v53  ;;  %vm705_vm4 = vweird.f32 %v1295_v55  ;;  %v1297_v3 = vpop.eup %1296 }
 0x188   :  { %vm706_vm6 = vmor %vm704_vm5, %vm705_vm4 }
 0x189   :  { %v701_v58 = vsub.f32 1.0, %v700_v56 }
 0x18b   :  { %v702_v60 = vmul.f32 %v1295_v55, %v701_v58 }
 0x18d   :  { %v703_v62 = vadd.f32 %v1295_v55, %v702_v60 }
 0x18f   :  { %v707_v0 = vsel %vm706_vm6, %v1295_v55, %v703_v62 }
 0x190   :  { %v712_v1 = vsel %vm709_vm7, %v711_v63, %v707_v0 }
 0x191   :  { %v715_v2 = vsub.f32 1.0, %v712_v1  ;;  %v714_v4 = vmul.f32 %v1297_v3, %v712_v1 }
 0x193   :  { %v716_v5 = vmul.f32 %v715_v2, %v1682_v27 }
 0x195   :  { %v717_v6 = vadd.f32 %v716_v5, %v714_v4 }
 0x197   :  { %719 = vst [vmem:[#allocation17 + $0x8] sm:$0xff] %v717_v6  ;;  %v720_v7 = vmul.f32 %v717_v6, %v1671_v26  ;;  %v1284_v26 = vld [vmem:[%s1713_s9 + $0x2] ss:$0 sm:$0xff] }
 0x199   :  { %v721_v8 = vpack.c.bf16 %v720_v7, %v720_v7 }
 0x19b   :  { %800 = vmatmul.bf16.vlgmr.msrb.gmra.mxu2 %v721_v8  ;;  %883 = vmatmul.bf16.vlgmr.msrb.gmra.mxu3 %v721_v8 }
 0x21e   :  { %v801_v10 = vpop.f32.mrf.mxu2  ;;  %v884_v11 = vpop.f32.mrf.mxu3 }
 0x21f   :  { %v885_v12 = vadd.f32 %v1285_v9, %v884_v11  ;;  %v802_v20 = vadd.f32 %v1284_v26, %v801_v10 }
 0x221   :  { %v1199_v13 = vmul.f32 -1.442695, %v885_v12 }
 0x223   :  { %1298 = vpow2.f32 %v1199_v13 }
 0x226   :  { %v803_v14 = vpop.f32.mrf.mxu2  ;;  %v886_v15 = vpop.f32.mrf.mxu3 }
 0x229   :  { %v1299_v16 = vpop.eup %1298 }
 0x22a   :  { %v892_v17 = vadd.f32 1.0, %v1299_v16 }
 0x22c   :  { %1300 = vrcp.f32 %v892_v17  ;;  %v904_v22 = vand.u32 2147483648, %v892_v17  ;;  %v902_v24 = vand.u32 2147483647, %v892_v17  ;;  %vm898_vm9 = vweird.f32 %v892_v17 }
 0x22d   :  { %1302 = vtanh.f32 %v802_v20 }
 0x22e   :  { %v905_v28 = vor.u32 1.1754944e-38, %v904_v22  ;;  %vm903_vm11 = vcmp.eq.f32.partialorder %v902_v24, 8.507059e+37 }
 0x232   :  { %v1301_v18 = vpop.eup %1300 }
 0x233   :  { %v894_v19 = vmul.f32 %v1301_v18, %v892_v17  ;;  %vm899_vm8 = vweird.f32 %v1301_v18  ;;  %v1303_v32 = vpop.eup %1302 }
 0x234   :  { %vm900_vm10 = vmor %vm898_vm9, %vm899_vm8 }
 0x235   :  { %v895_v21 = vsub.f32 1.0, %v894_v19 }
 0x237   :  { %v896_v23 = vmul.f32 %v1301_v18, %v895_v21 }
 0x239   :  { %v897_v27 = vadd.f32 %v1301_v18, %v896_v23 }
 0x23b   :  { %v901_v29 = vsel %vm900_vm10, %v1301_v18, %v897_v27 }
 0x23c   :  { %v906_v30 = vsel %vm903_vm11, %v905_v28, %v901_v29 }
 0x23d   :  { %v909_v31 = vsub.f32 1.0, %v906_v30  ;;  %v908_v33 = vmul.f32 %v1303_v32, %v906_v30 }
 0x23f   :  { %v910_v34 = vmul.f32 %v909_v31, %v717_v6 }
 0x241   :  { %v911_v25 = vadd.f32 %v910_v34, %v908_v33 }
 0x243   :  { %913 = vst [vmem:[#allocation17 + $0x10] sm:$0xff] %v911_v25 }
 0x244   :  { %926 = dma.vmem_to_hbm [thread:$0]  %s919_s25, 384, %s921_s1, [#allocation4], %s1568_s0, %s1568_s0, %s1569_s29  }
 0x245   :  { %1554 = dma.done.wait [#allocation4], 384  }
 0x246   :  { %1555 = vsyncadd [#allocation4], 4294966912 }
 0x247   :  { %931 = vsyncpa [#allocation3], 1 }
 0x248   :  { %932 = vsyncpa [#allocation6], 1 }
 0x249   :  { %933 = vsyncpa [#allocation9], 1 }
 0x24a   :  { %934 = vsyncpa [#allocation12], 1 }
 0x24b   :  { %935 = vsyncpa [#allocation15], 1 }
 0x24c   :  { %936 = vsyncpa [#allocation4], 1 }

</bundles_post_ra>
